<compile_context>
chip_gen: v6e
topology: v6e:2x2x1
jax: 0.10.0
libtpu: 0.0.40
codegen_flags: <defaults>
</compile_context>

<pallas_src>
import functools

import jax
import jax.numpy as jnp
from jax.experimental import pallas as pl
from jax.experimental.pallas import tpu as pltpu

IMAGE_DIM = 28 * 28
NUM_CLASSES = 10
LANE = 128          # TPU lane width
MAX_TILE_B = 256    # batch tile for large batches (multiple of 8, matches MXU)


def _fused_mlp_kernel(*refs, n_layers, activation):
    """refs = (x_ref, w0, b0, w1, b1, ..., o_ref). Whole MLP on one tile."""
    x_ref = refs[0]
    o_ref = refs[-1]
    h = x_ref[...]  # f32 (tile_b, 784)
    for i in range(n_layers):
        w = refs[1 + 2 * i][...]          # bf16 (in_dim, out_dim)
        b = refs[2 + 2 * i][...]          # f32  (1, out_dim)
        # MXU matmul in bf16 with f32 accumulation, bias add in f32.
        y = jnp.dot(h.astype(jnp.bfloat16), w,
                    preferred_element_type=jnp.float32) + b
        if i < n_layers - 1:
            if activation == "ELU":
                # ELU(alpha=1): y if y>0 else exp(y)-1.  Clamp exp argument so
                # the unselected branch never overflows.
                y = jnp.where(y > 0, y, jnp.exp(jnp.minimum(y, 0.0)) - 1.0)
            elif activation == "Sigmoid":
                y = pl.reciprocal(1.0 + jnp.exp(-y), approx=True)
            else:
                raise ValueError(f"unknown activation {activation}")
        h = y
    o_ref[...] = h.astype(o_ref.dtype)


def _round_up(x, m):
    return ((x + m - 1) // m) * m


def mlp_forward(x_nchw, params, activation):
    """Forward pass matching MLP.forward: flatten -> (Linear, act)* -> Linear.

    params: list of (w, b) with w stored as (in_dim, out_dim) f32,
            b as (out_dim,) f32 (torch weights transposed).
    """
    batch = x_nchw.shape[0]
    x = x_nchw.reshape(batch, -1).astype(jnp.float32)   # nn.Flatten()
    in_dim = x.shape[1]
    n_layers = len(params)
    out_dim = params[-1][0].shape[1]
    out_pad = _round_up(max(out_dim, LANE), LANE)        # lane-dense output

    # Batch tiling: single full-extent tile for small batches, 256-row tiles
    # (multiple of the f32 sublane count, matches the 256-wide MXU) otherwise.
    if batch <= MAX_TILE_B:
        tile_b, batch_pad = batch, batch
    else:
        tile_b = MAX_TILE_B
        batch_pad = _round_up(batch, tile_b)
        x = jnp.pad(x, ((0, batch_pad - batch), (0, 0)))

    # Prepare operands: weights in bf16 (MXU-native), biases f32 as (1, out).
    # Final layer is zero-padded to `out_pad` lanes.
    flat_inputs = [x]
    flops = 0
    transcendentals = 0
    bytes_accessed = x.size * 4
    for i, (w, b) in enumerate(params):
        if i == n_layers - 1 and w.shape[1] != out_pad:
            w = jnp.pad(w, ((0, 0), (0, out_pad - w.shape[1])))
            b = jnp.pad(b, ((0, out_pad - b.shape[0]),))
        flat_inputs.append(w.astype(jnp.bfloat16))
        flat_inputs.append(b.reshape(1, -1).astype(jnp.float32))
        flops += 2 * batch_pad * w.shape[0] * w.shape[1]
        if i < n_layers - 1:
            transcendentals += batch_pad * w.shape[1]
        bytes_accessed += w.shape[0] * w.shape[1] * 2 + w.shape[1] * 4
    bytes_accessed += batch_pad * out_pad * 4

    # BlockSpecs: x/out tiled over batch; every weight/bias block index is
    # constant along the batch axis -> resident in VMEM across the grid.
    in_specs = [pl.BlockSpec((tile_b, in_dim), lambda i: (i, 0))]
    for a in flat_inputs[1:]:
        in_specs.append(pl.BlockSpec(a.shape, lambda i: (0, 0)))
    out_specs = pl.BlockSpec((tile_b, out_pad), lambda i: (i, 0))

    kernel = functools.partial(
        _fused_mlp_kernel, n_layers=n_layers, activation=activation)

    out_full = pl.pallas_call(
        kernel,
        out_shape=jax.ShapeDtypeStruct((batch_pad, out_pad), jnp.float32),
        grid=(batch_pad // tile_b,),
        in_specs=in_specs,
        out_specs=out_specs,
        compiler_params=pltpu.CompilerParams(
            dimension_semantics=("parallel",)),
        cost_estimate=pl.CostEstimate(
            flops=flops,
            transcendentals=transcendentals,
            bytes_accessed=bytes_accessed),
    )(*flat_inputs)

    return out_full[:batch, :out_dim]


def init_mlp_params(key, hidden_dims):
    """Torch-like nn.Linear init (U[-k, k], k=1/sqrt(fan_in)).

    Weights stored pre-transposed as (in_dim, out_dim) so the kernel computes
    y = x @ W + b with the feature axis on the lane dimension.
    """
    dims = [IMAGE_DIM] + list(hidden_dims) + [NUM_CLASSES]
    params = []
    for i in range(len(dims) - 1):
        in_dim, out_dim = dims[i], dims[i + 1]
        key, kw, kb = jax.random.split(key, 3)
        bound = 1.0 / jnp.sqrt(jnp.float32(in_dim))
        w = jax.random.uniform(kw, (in_dim, out_dim), jnp.float32, -bound, bound)
        b = jax.random.uniform(kb, (out_dim,), jnp.float32, -bound, bound)
        params.append((w, b))
    return params


def _reference_forward(x_nchw, params, activation):
    """Pure-JAX reference with the same bf16-matmul numerics as the kernel."""
    x = x_nchw.reshape(x_nchw.shape[0], -1).astype(jnp.float32)
    n_layers = len(params)
    for i, (w, b) in enumerate(params):
        y = jnp.dot(x.astype(jnp.bfloat16), w.astype(jnp.bfloat16),
                    preferred_element_type=jnp.float32) + b
        if i < n_layers - 1:
            if activation == "ELU":
                y = jnp.where(y > 0, y, jnp.exp(jnp.minimum(y, 0.0)) - 1.0)
            elif activation == "Sigmoid":
                y = 1.0 / (1.0 + jnp.exp(-y))
        x = y
    return x


if __name__ == "__main__":
    key = jax.random.PRNGKey(0)
    k_in, k_params = jax.random.split(key)

    hidden_dims = (128, 64)
    activation = "ELU"

    batch = 2
    x = jax.random.normal(k_in, (batch, 1, 28, 28), dtype=jnp.float32)
    params = init_mlp_params(k_params, hidden_dims)

    out = mlp_forward(x, params, activation)
    out = jax.block_until_ready(out)

    assert out.shape == (batch, NUM_CLASSES), out.shape
    assert out.dtype == jnp.float32, out.dtype

    ref = _reference_forward(x, params, activation)
    assert jnp.allclose(out, ref, rtol=1e-3, atol=1e-3), (out, ref)

    print("KERNEL_OK")
</pallas_src>

<mosaic_0001>
module attributes {stable_mosaic.version = 11 : i64} {
  func.func @_fused_mlp_kernel(%arg0: i32, %arg1: memref<2x784xf32, #tpu.memory_space<vmem>>, %arg2: memref<784x128xbf16, #tpu.memory_space<vmem>>, %arg3: memref<1x128xf32, #tpu.memory_space<vmem>>, %arg4: memref<128x64xbf16, #tpu.memory_space<vmem>>, %arg5: memref<1x64xf32, #tpu.memory_space<vmem>>, %arg6: memref<64x128xbf16, #tpu.memory_space<vmem>>, %arg7: memref<1x128xf32, #tpu.memory_space<vmem>>, %arg8: memref<2x128xf32, #tpu.memory_space<vmem>>) attributes {dimension_semantics = [#tpu.dimension_semantics<parallel>], iteration_bounds = array<i64: 1>, scalar_prefetch = 0 : i64, scratch_operands = 0 : i64, tpu.core_type = #tpu.core_type<tc>, window_params = [{transform_indices = @transform_0, window_bounds = array<i64: 2, 784>}, {pipeline_mode = #tpu.pipeline_mode<synchronous>, transform_indices = @transform_1, window_bounds = array<i64: 784, 128>}, {pipeline_mode = #tpu.pipeline_mode<synchronous>, transform_indices = @transform_2, window_bounds = array<i64: 1, 128>}, {pipeline_mode = #tpu.pipeline_mode<synchronous>, transform_indices = @transform_3, window_bounds = array<i64: 128, 64>}, {pipeline_mode = #tpu.pipeline_mode<synchronous>, transform_indices = @transform_4, window_bounds = array<i64: 1, 64>}, {pipeline_mode = #tpu.pipeline_mode<synchronous>, transform_indices = @transform_5, window_bounds = array<i64: 64, 128>}, {pipeline_mode = #tpu.pipeline_mode<synchronous>, transform_indices = @transform_6, window_bounds = array<i64: 1, 128>}, {transform_indices = @transform_7, window_bounds = array<i64: 2, 128>}]} {
    %c0 = arith.constant 0 : index
    %c0_0 = arith.constant 0 : index
    %0 = vector.load %arg1[%c0, %c0_0] : memref<2x784xf32, #tpu.memory_space<vmem>>, vector<2x784xf32>
    %c0_1 = arith.constant 0 : index
    %c0_2 = arith.constant 0 : index
    %1 = vector.load %arg2[%c0_1, %c0_2] : memref<784x128xbf16, #tpu.memory_space<vmem>>, vector<784x128xbf16>
    %c0_3 = arith.constant 0 : index
    %c0_4 = arith.constant 0 : index
    %2 = vector.load %arg3[%c0_3, %c0_4] : memref<1x128xf32, #tpu.memory_space<vmem>>, vector<1x128xf32>
    %3 = arith.truncf %0 : vector<2x784xf32> to vector<2x784xbf16>
    %cst = arith.constant dense<0.000000e+00> : vector<2x128xf32>
    %4 = tpu.matmul %3, %1, %cst {dimension_numbers = #tpu.dot_dimension_numbers<[1], [0], [0], [1], [0, 0, 1, 1], [], []>} : vector<2x784xbf16>, vector<784x128xbf16>, vector<2x128xf32> -> vector<2x128xf32>
    %5 = vector.broadcast %2 : vector<1x128xf32> to vector<2x128xf32>
    %6 = arith.addf %4, %5 : vector<2x128xf32>
    %cst_5 = arith.constant 0.000000e+00 : f32
    %7 = vector.broadcast %cst_5 : f32 to vector<2x128xf32>
    %8 = arith.cmpf ogt, %6, %7 : vector<2x128xf32>
    %cst_6 = arith.constant 0.000000e+00 : f32
    %9 = vector.broadcast %cst_6 : f32 to vector<2x128xf32>
    %10 = arith.minimumf %6, %9 : vector<2x128xf32>
    %11 = math.exp %10 : vector<2x128xf32>
    %cst_7 = arith.constant 1.000000e+00 : f32
    %12 = vector.broadcast %cst_7 : f32 to vector<2x128xf32>
    %13 = arith.subf %11, %12 : vector<2x128xf32>
    %14 = arith.select %8, %6, %13 : vector<2x128xi1>, vector<2x128xf32>
    %c0_8 = arith.constant 0 : index
    %c0_9 = arith.constant 0 : index
    %15 = vector.load %arg4[%c0_8, %c0_9] : memref<128x64xbf16, #tpu.memory_space<vmem>>, vector<128x64xbf16>
    %c0_10 = arith.constant 0 : index
    %c0_11 = arith.constant 0 : index
    %16 = vector.load %arg5[%c0_10, %c0_11] : memref<1x64xf32, #tpu.memory_space<vmem>>, vector<1x64xf32>
    %17 = arith.truncf %14 : vector<2x128xf32> to vector<2x128xbf16>
    %cst_12 = arith.constant dense<0.000000e+00> : vector<2x64xf32>
    %18 = tpu.matmul %17, %15, %cst_12 {dimension_numbers = #tpu.dot_dimension_numbers<[1], [0], [0], [1], [0, 0, 1, 1], [], []>} : vector<2x128xbf16>, vector<128x64xbf16>, vector<2x64xf32> -> vector<2x64xf32>
    %19 = vector.broadcast %16 : vector<1x64xf32> to vector<2x64xf32>
    %20 = arith.addf %18, %19 : vector<2x64xf32>
    %cst_13 = arith.constant 0.000000e+00 : f32
    %21 = vector.broadcast %cst_13 : f32 to vector<2x64xf32>
    %22 = arith.cmpf ogt, %20, %21 : vector<2x64xf32>
    %cst_14 = arith.constant 0.000000e+00 : f32
    %23 = vector.broadcast %cst_14 : f32 to vector<2x64xf32>
    %24 = arith.minimumf %20, %23 : vector<2x64xf32>
    %25 = math.exp %24 : vector<2x64xf32>
    %cst_15 = arith.constant 1.000000e+00 : f32
    %26 = vector.broadcast %cst_15 : f32 to vector<2x64xf32>
    %27 = arith.subf %25, %26 : vector<2x64xf32>
    %28 = arith.select %22, %20, %27 : vector<2x64xi1>, vector<2x64xf32>
    %c0_16 = arith.constant 0 : index
    %c0_17 = arith.constant 0 : index
    %29 = vector.load %arg6[%c0_16, %c0_17] : memref<64x128xbf16, #tpu.memory_space<vmem>>, vector<64x128xbf16>
    %c0_18 = arith.constant 0 : index
    %c0_19 = arith.constant 0 : index
    %30 = vector.load %arg7[%c0_18, %c0_19] : memref<1x128xf32, #tpu.memory_space<vmem>>, vector<1x128xf32>
    %31 = arith.truncf %28 : vector<2x64xf32> to vector<2x64xbf16>
    %cst_20 = arith.constant dense<0.000000e+00> : vector<2x128xf32>
    %32 = tpu.matmul %31, %29, %cst_20 {dimension_numbers = #tpu.dot_dimension_numbers<[1], [0], [0], [1], [0, 0, 1, 1], [], []>} : vector<2x64xbf16>, vector<64x128xbf16>, vector<2x128xf32> -> vector<2x128xf32>
    %33 = vector.broadcast %30 : vector<1x128xf32> to vector<2x128xf32>
    %34 = arith.addf %32, %33 : vector<2x128xf32>
    %c0_21 = arith.constant 0 : index
    %c0_22 = arith.constant 0 : index
    %35 = vector.load %arg8[%c0_21, %c0_22] : memref<2x128xf32, #tpu.memory_space<vmem>>, vector<2x128xf32>
    tpu.vector_store %arg8[%c0_21, %c0_22], %34 {strides = array<i32>} : memref<2x128xf32, #tpu.memory_space<vmem>>, vector<2x128xf32>,
    return
  }
  func.func @transform_0(%arg0: i32) -> (i32, i32) {
    %c0_i32 = arith.constant 0 : i32
    %c0_i32_0 = arith.constant 0 : i32
    return %arg0, %c0_i32 : i32, i32
  }
  func.func @transform_1(%arg0: i32) -> (i32, i32) {
    %c0_i32 = arith.constant 0 : i32
    %c0_i32_0 = arith.constant 0 : i32
    %c0_i32_1 = arith.constant 0 : i32
    return %c0_i32, %c0_i32_0 : i32, i32
  }
  func.func @transform_2(%arg0: i32) -> (i32, i32) {
    %c0_i32 = arith.constant 0 : i32
    %c0_i32_0 = arith.constant 0 : i32
    %c0_i32_1 = arith.constant 0 : i32
    return %c0_i32, %c0_i32_0 : i32, i32
  }
  func.func @transform_3(%arg0: i32) -> (i32, i32) {
    %c0_i32 = arith.constant 0 : i32
    %c0_i32_0 = arith.constant 0 : i32
    %c0_i32_1 = arith.constant 0 : i32
    return %c0_i32, %c0_i32_0 : i32, i32
  }
  func.func @transform_4(%arg0: i32) -> (i32, i32) {
    %c0_i32 = arith.constant 0 : i32
    %c0_i32_0 = arith.constant 0 : i32
    %c0_i32_1 = arith.constant 0 : i32
    return %c0_i32, %c0_i32_0 : i32, i32
  }
  func.func @transform_5(%arg0: i32) -> (i32, i32) {
    %c0_i32 = arith.constant 0 : i32
    %c0_i32_0 = arith.constant 0 : i32
    %c0_i32_1 = arith.constant 0 : i32
    return %c0_i32, %c0_i32_0 : i32, i32
  }
  func.func @transform_6(%arg0: i32) -> (i32, i32) {
    %c0_i32 = arith.constant 0 : i32
    %c0_i32_0 = arith.constant 0 : i32
    %c0_i32_1 = arith.constant 0 : i32
    return %c0_i32, %c0_i32_0 : i32, i32
  }
  func.func @transform_7(%arg0: i32) -> (i32, i32) {
    %c0_i32 = arith.constant 0 : i32
    %c0_i32_0 = arith.constant 0 : i32
    return %arg0, %c0_i32 : i32, i32
  }
}

</mosaic_0001>

<bundles_post_ra>
// kernel: tpu_custom_call.1
= control target key start
LH: loop header
LB: loop body
LE: loop exit
PB: predicated region body
PF: predicated region fallthrough
CT: control target
= control target key end

     0   :  { %12 = vsyncpa [#allocation3], 0  ;;  %s1310_s0 = inlined_call_operand.vmem [shape: f32[2,784], index: 0, kind: input, shape index: {}]   ;;  %s1311_s1 = inlined_call_operand.hbm [shape: bf16[784,128], index: 1, kind: input, shape index: {}]   ;;  %s1312_s2 = inlined_call_operand.vmem [shape: f32[1,128], index: 2, kind: input, shape index: {}]   ;;  %s1313_s3 = inlined_call_operand.vmem [shape: bf16[128,64], index: 3, kind: input, shape index: {}]   ;;  %s1314_s4 = inlined_call_operand.vmem [shape: f32[1,64], index: 4, kind: input, shape index: {}]   ;;  %s1315_s5 = inlined_call_operand.vmem [shape: bf16[64,128], index: 5, kind: input, shape index: {}]   ;;  %s1316_s6 = inlined_call_operand.vmem [shape: f32[1,128], index: 6, kind: input, shape index: {}]   ;;  %s1317_s7 = inlined_call_operand.hbm [shape: f32[2,128], index: 7, kind: output, shape index: {}]  }
   0x1   :  { %13 = vsyncpa [#allocation4], 0  ;;  %s1186_s24 = smov [#allocation2]  }
   0x2   :  { %s21_s25 = sshll.u32 %s1186_s24, 4  ;;  %s22_s25 = int_to_ptr.vmem [resolvable:$true] %s21_s25 }
   0x3   :  { %s1150_s26 = scalar_lea.vmem %s22_s25, 6272  ;;  %p1155_p1 = scmp.lt.s32.totalorder %s22_s25, %s22_s25 }
   0x4   :  { %p1151_p0 = scmp.ne.s32.totalorder %s22_s25, %s1150_s26  ;;  %p1156_p2 = scmp.lt.s32.totalorder %s1150_s26, %s1150_s26 }
   0x6   :  { %p1157_p3 = por %p1156_p2, %p1155_p1 }
   0x8   :  { %p1158_p4 = pnand %p1157_p3, %p1151_p0 }
   0xa   :  { %1161 = shalt.err (!%p1158_p4)
}
   0xb   :  { %s1187_s27 = smov 64   ;;  %s1188_s28 = smov 4  }
   0xc   :  { %27 = dma.hbm_to_vmem [thread:$0]  %s1311_s1, 6272, %s22_s25, [#allocation3], %s1187_s27, %s1187_s27, %s1188_s28  }
   0xd   :  { %1182 = dma.done.wait [#allocation3], 6272  }
   0xe   :  { %1183 = vsyncadd [#allocation3], 4294961024  ;;  %v1075_v0 = vld [vmem:[#allocation2 + $0x78] sm:$0xff]   ;;  %v1079_v4 = vld [vmem:[#allocation2 + $0x70] sm:$0xff]   ;;  %v1189_v21 = vmov 1983009808   ;;  %v149_v23 = vlaneseq }
   0xf   :  { %v1076_v1 = vld [vmem:[#allocation2 + $0x38] sm:$0xff]   ;;  %948 = vmatprep.subr.bf16.mxu0 %v1075_v0  ;;  %v1080_v5 = vld [vmem:[#allocation2 + $0x30] sm:$0xff]   ;;  %v1083_v8 = vld [vmem:[#allocation2 + $0x68] sm:$0xff]   ;;  %v147_v22 = vunpack.c.l.s4 %v1189_v21  ;;  %v1190_v45 = vmov 0.0   ;;  %vm1191_vm0 = vmmov 0   ;;  %vm492_vm1 = vcmask 130048  }
  0x10   :  { %v1077_v2 = vld [vmem:[#allocation2 + $0xf8] sm:$0xff]   ;;  %949 = vmatpush3.bf16.msra.mxu0 %v1076_v1  ;;  %v1081_v6 = vld [vmem:[#allocation2 + $0xf0] sm:$0xff]   ;;  %v1084_v9 = vld [vmem:[#allocation2 + $0x28] sm:$0xff]   ;;  %v150_v29 = vshrl.u32 %v149_v23, 7  ;;  %vm820_vm4 = vcmask 523264  }
  0x11   :  { %v1078_v3 = vld [vmem:[#allocation2 + $0xb8] sm:$0xff]   ;;  %970 = vmatprep.subr.bf16.mxu1 %v1077_v2  ;;  %950 = vmatprep.subr.bf16.mxu0 %v1079_v4  ;;  %v1082_v7 = vld [vmem:[#allocation2 + $0xb0] sm:$0xff]   ;;  %v1085_v10 = vld [vmem:[#allocation2 + $0xe8] sm:$0xff]   ;;  %v148_v28 = vunpack.c.0.s8 %v147_v22 }
  0x12   :  { %971 = vmatpush3.bf16.msra.mxu1 %v1078_v3  ;;  %v1086_v11 = vld [vmem:[#allocation2 + $0xa8] sm:$0xff]   ;;  %v1087_v12 = vld [vmem:[#allocation2 + $0x60] sm:$0xff]   ;;  %v1091_v16 = vld [vmem:[#allocation2 + $0x58] sm:$0xff]  }
  0x13   :  { %972 = vmatprep.subr.bf16.mxu1 %v1081_v6  ;;  %v1088_v13 = vld [vmem:[#allocation2 + $0x20] sm:$0xff]   ;;  %v1092_v17 = vld [vmem:[#allocation2 + $0x18] sm:$0xff]   ;;  %v1095_v20 = vld [vmem:[#allocation2 + $0x50] sm:$0xff]   ;;  %v151_v34 = vsub.s32 %v148_v28, %v150_v29 }
  0x14   :  { %951 = vmatpush3.bf16.msra.mxu0 %v1080_v5  ;;  %v1089_v14 = vld [vmem:[#allocation2 + $0xe0] sm:$0xff]   ;;  %v1093_v18 = vld [vmem:[#allocation2 + $0xd8] sm:$0xff]   ;;  %v1096_v24 = vld [vmem:[#allocation2 + $0x10] sm:$0xff]  }
  0x15   :  { %952 = vmatprep.subr.bf16.mxu0 %v1083_v8  ;;  %v1090_v15 = vld [vmem:[#allocation2 + $0xa0] sm:$0xff]   ;;  %v1094_v19 = vld [vmem:[#allocation2 + $0x98] sm:$0xff]   ;;  %v1097_v25 = vld [vmem:[#allocation2 + $0xd0] sm:$0xff]  }
  0x16   :  { %973 = vmatpush3.bf16.msra.mxu1 %v1082_v7  ;;  %v1098_v26 = vld [vmem:[#allocation2 + $0x90] sm:$0xff]   ;;  %v1099_v27 = vld [vmem:[#allocation2 + $0x48] sm:$0xff]   ;;  %v1103_v33 = vld [vmem:[#allocation2 + $0x40] sm:$0xff]  }
  0x17   :  { %974 = vmatprep.subr.bf16.mxu1 %v1085_v10  ;;  %v1100_v30 = vld [vmem:[#allocation2 + $0x8] sm:$0xff]   ;;  %v1104_v35 = vld [vmem:[#allocation2] sm:$0xff]   ;;  %v1107_v41 = vld [vmem:[#allocation2 + $0x178] sm:$0xff]  }
  0x18   :  { %953 = vmatpush3.bf16.msra.mxu0 %v1084_v9  ;;  %v1101_v31 = vld [vmem:[#allocation2 + $0xc8] sm:$0xff]   ;;  %v1105_v36 = vld [vmem:[#allocation2 + $0xc0] sm:$0xff]   ;;  %v1109_v48 = vld [vmem:[#allocation2 + $0x138] sm:$0xff]  }
  0x19   :  { %954 = vmatprep.subr.bf16.mxu0 %v1087_v12  ;;  %v1102_v32 = vld [vmem:[#allocation2 + $0x88] sm:$0xff]   ;;  %v42_v37 = vld [vmem:[%s1310_s0] sm:$0xff]  ;;  %v1110_v50 = vld [vmem:[#allocation2 + $0x170] sm:$0xff]  }
  0x1a   :  { %975 = vmatpush3.bf16.msra.mxu1 %v1086_v11  ;;  %v152_v38 = vrot.slane %v42_v37, %v151_v34  ;;  %v1106_v39 = vld [vmem:[#allocation2 + $0x80] sm:$0xff]   ;;  %v145_v40 = vcombine.high %v42_v37, %v42_v37  ;;  %v1111_v52 = vld [vmem:[#allocation2 + $0x130] sm:$0xff]   ;;  %v1112_v53 = vld [vmem:[#allocation2 + $0x168] sm:$0xff]  }
  0x1b   :  { %976 = vmatprep.subr.bf16.mxu1 %v1089_v14  ;;  %v1113_v54 = vld [vmem:[#allocation2 + $0x128] sm:$0xff]   ;;  %v1114_v55 = vld [vmem:[#allocation2 + $0x160] sm:$0xff]   ;;  %v1116_v57 = vld [vmem:[#allocation2 + $0x158] sm:$0xff]  }
  0x1c   :  { %955 = vmatpush3.bf16.msra.mxu0 %v1088_v13  ;;  %v160_v42 = vcombine.high %v152_v38, %v152_v38  ;;  %v159_v43 = vrot.slane %v145_v40, %v151_v34  ;;  %v185_v44 = vpack.c.bf16 %v152_v38, %v152_v38  ;;  %v1115_v56 = vld [vmem:[#allocation2 + $0x120] sm:$0xff]   ;;  %v43_v59 = vld [vmem:[%s1310_s0 + $0x8] sm:$0x3f]  ;;  %v1117_v60 = vld [vmem:[#allocation2 + $0x118] sm:$0xff]  }
  0x1d   :  { %956 = vmatprep.subr.bf16.mxu0 %v1091_v16  ;;  %v1124_v58 = vld [vmem:[#allocation2 + $0x180] sm:$0xff]   ;;  %v162_v61 = vcombine.high %v43_v59, %v43_v59  ;;  %v169_v62 = vrot.slane %v43_v59, %v151_v34  ;;  %v1118_v63 = vld [vmem:[#allocation2 + $0x150] sm:$0xff]   ;;  %v1120_v5 = vld [vmem:[#allocation2 + $0x148] sm:$0xff]  }
  0x1e   :  { %977 = vmatpush3.bf16.msra.mxu1 %v1090_v15  ;;  %v186_v46 = vpack.c.bf16 %v160_v42, %v160_v42  ;;  %v161_v47 = vcombine.high %v159_v43, %v159_v43  ;;  %v187_v49 = vpack.c.bf16 %v159_v43, %v159_v43  ;;  %v1119_v2 = vld [vmem:[#allocation2 + $0x110] sm:$0xff]   ;;  %v1121_v6 = vld [vmem:[#allocation2 + $0x108] sm:$0xff]   ;;  %v1122_v7 = vld [vmem:[#allocation2 + $0x140] sm:$0xff]  }
  0x1f   :  { %978 = vmatprep.subr.bf16.mxu1 %v1093_v18  ;;  %v176_v0 = vrot.slane %v162_v61, %v151_v34  ;;  %v177_v1 = vcombine.high %v169_v62, %v169_v62  ;;  %v1123_v8 = vld [vmem:[#allocation2 + $0x100] sm:$0xff]   ;;  %v189_v9 = vpack.c.bf16 %v169_v62, %v169_v62  ;;  %v1126_v10 = vld [vmem:[%s1313_s3 + $0x38] sm:$0xff]   ;;  %v1127_v11 = vld [vmem:[%s1313_s3 + $0x30] sm:$0xff]  }
  0x20   :  { %957 = vmatpush3.bf16.msra.mxu0 %v1092_v17  ;;  %528 = vmatprep.mubr.bf16.mxu0 %v186_v46  ;;  %v188_v51 = vpack.c.bf16 %v161_v47, %v161_v47  ;;  %v1128_v12 = vld [vmem:[%s1313_s3 + $0x28] sm:$0xff]   ;;  %v1129_v13 = vld [vmem:[%s1313_s3 + $0x20] sm:$0xff]   ;;  %v1130_v14 = vld [vmem:[%s1313_s3 + $0x18] sm:$0xff]  }
  0x21   :  { %958 = vmatprep.subr.bf16.mxu0 %v1095_v20  ;;  %v190_v3 = vpack.c.bf16 %v177_v1, %v177_v1  ;;  %v191_v4 = vpack.c.bf16 %v176_v0, %v176_v0  ;;  %v1131_v15 = vld [vmem:[%s1313_s3 + $0x10] sm:$0xff]   ;;  %v1132_v16 = vld [vmem:[%s1313_s3 + $0x8] sm:$0xff]   ;;  %v1133_v17 = vld [vmem:[%s1313_s3] sm:$0xff]  }
  0x22   :  { %979 = vmatpush3.bf16.msra.mxu1 %v1094_v19  ;;  %568 = vmatprep.mubr.bf16.mxu1 %v188_v51  ;;  %v1136_v51 = vld [vmem:[%s1315_s5 + $0x8] sm:$0xff]   ;;  %v942_v0 = vld [vmem:[%s1316_s6] ss:$0 sm:$0xff] }
  0x23   :  { %980 = vmatprep.subr.bf16.mxu1 %v1097_v25 }
  0x24   :  { %959 = vmatpush3.bf16.msra.mxu0 %v1096_v24 }
  0x25   :  { %960 = vmatprep.subr.bf16.mxu0 %v1099_v27 }
  0x26   :  { %981 = vmatpush3.bf16.msra.mxu1 %v1098_v26 }
  0x27   :  { %982 = vmatprep.subr.bf16.mxu1 %v1101_v31  ;;  %v880_v31 = vld [vmem:[%s1312_s2] ss:$0 sm:$0xff] }
  0x28   :  { %961 = vmatpush3.bf16.msra.mxu0 %v1100_v30 }
  0x29   :  { %962 = vmatprep.subr.bf16.mxu0 %v1103_v33 }
  0x2a   :  { %983 = vmatpush3.bf16.msra.mxu1 %v1102_v32 }
  0x2b   :  { %984 = vmatprep.subr.bf16.mxu1 %v1105_v36 }
  0x2c   :  { %963 = vmatpush3.bf16.msra.mxu0 %v1104_v35 }
  0x2d   :  { %992 = vmatprep.subr.bf16.mxu0 %v1107_v41 }
  0x2e   :  { %985 = vmatpush3.bf16.msra.mxu1 %v1106_v39 }
  0x2f   :  { %1030 = vmatprep.subr.bf16.mxu1 %v1190_v45  ;;  %529 = vmatmul.mubr.bf16.vlgmr.msra.gmra.mxu0 %v185_v44 }
  0x30   :  { %993 = vmatpush3.bf16.msra.mxu0 %v1109_v48  ;;  %608 = vmatprep.mubr.bf16.mxu0 %v190_v3 }
  0x31   :  { %569 = vmatmul.mubr.bf16.vlgmr.msra.gmra.mxu1 %v187_v49  ;;  %994 = vmatprep.subr.bf16.mxu0 %v1110_v50  ;;  %v1134_v49 = vld [vmem:[%s1315_s5 + $0x18] sm:$0xff]   ;;  %v1135_v50 = vld [vmem:[%s1315_s5 + $0x10] sm:$0xff]  }
  0x32   :  { %1032 = vmatprep.mubr.msk.bf16.mxu1 %vm1191_vm0, %v1190_v45  ;;  %1031 = vmatpush3.bf16.msra.mxu1 %v1124_v58 }
  0x33   :  { %1036 = vmatprep.subr.bf16.mxu1 %v1190_v45 }
  0x34   :  { %995 = vmatpush3.bf16.msra.mxu0 %v1111_v52  ;;  %v1137_v52 = vld [vmem:[%s1315_s5] sm:$0xff]  }
  0x35   :  { %996 = vmatprep.subr.bf16.mxu0 %v1112_v53  ;;  %v932_v53 = vld [vmem:[%s1314_s4] ss:$0 sm:$0xff]  ;;  %s1192_s4 = smov [#allocation5]  }
  0x36   :  { %s871_s12 = sshll.u32 %s1192_s4, 4  ;;  %s872_s12 = int_to_ptr.vmem [resolvable:$true] %s871_s12 }
  0x37   :  { %s1162_s13 = scalar_lea.vmem %s872_s12, 32  ;;  %p1167_p6 = scmp.lt.s32.totalorder %s872_s12, %s872_s12 }
  0x38   :  { %997 = vmatpush3.bf16.msra.mxu0 %v1113_v54  ;;  %p1163_p5 = scmp.ne.s32.totalorder %s872_s12, %s1162_s13  ;;  %p1168_p7 = scmp.lt.s32.totalorder %s1162_s13, %s1162_s13 }
  0x39   :  { %998 = vmatprep.subr.bf16.mxu0 %v1114_v55  ;;  %1033 = vmatmul.mubr.msk.bf16.vlgmr.msra.gmra.mxu1 %vm492_vm1, %v191_v4 }
  0x3a   :  { %1052 = vmatprep.mubr.msk.bf16.mxu1 %vm1191_vm0, %v1190_v45  ;;  %1037 = vmatpush3.bf16.msra.mxu1 %v1126_v10  ;;  %p1169_p8 = por %p1168_p7, %p1167_p6 }
  0x3b   :  { %1038 = vmatprep.subr.bf16.mxu1 %v1190_v45 }
  0x3c   :  { %999 = vmatpush3.bf16.msra.mxu0 %v1115_v56  ;;  %p1170_p9 = pnand %p1169_p8, %p1163_p5 }
  0x3d   :  { %1000 = vmatprep.subr.bf16.mxu0 %v1116_v57 }
  0x3e   :  { %1039 = vmatpush3.bf16.msra.mxu1 %v1127_v11 }
  0x3f   :  { %1040 = vmatprep.subr.bf16.mxu1 %v1190_v45 }
  0x40   :  { %1001 = vmatpush3.bf16.msra.mxu0 %v1117_v60 }
  0x41   :  { %1002 = vmatprep.subr.bf16.mxu0 %v1118_v63 }
  0x42   :  { %1041 = vmatpush3.bf16.msra.mxu1 %v1128_v12 }
  0x43   :  { %1042 = vmatprep.subr.bf16.mxu1 %v1190_v45 }
  0x44   :  { %1003 = vmatpush3.bf16.msra.mxu0 %v1119_v2 }
  0x45   :  { %1004 = vmatprep.subr.bf16.mxu0 %v1120_v5 }
  0x46   :  { %1043 = vmatpush3.bf16.msra.mxu1 %v1129_v13 }
  0x47   :  { %1044 = vmatprep.subr.bf16.mxu1 %v1190_v45 }
  0x48   :  { %1005 = vmatpush3.bf16.msra.mxu0 %v1121_v6 }
  0x49   :  { %1006 = vmatprep.subr.bf16.mxu0 %v1122_v7 }
  0x4a   :  { %1045 = vmatpush3.bf16.msra.mxu1 %v1130_v14 }
  0x4b   :  { %1046 = vmatprep.subr.bf16.mxu1 %v1190_v45 }
  0x4c   :  { %1007 = vmatpush3.bf16.msra.mxu0 %v1123_v8 }
  0x4d   :  { %1056 = vmatprep.subr.bf16.mxu0 %v1190_v45 }
  0x4e   :  { %1047 = vmatpush3.bf16.msra.mxu1 %v1131_v15 }
  0x4f   :  { %609 = vmatmul.mubr.bf16.vlgmr.msra.gmra.mxu0 %v189_v9  ;;  %1048 = vmatprep.subr.bf16.mxu1 %v1190_v45 }
  0x50   :  { %1064 = vmatprep.mubr.msk.bf16.mxu0 %vm1191_vm0, %v1190_v45  ;;  %1057 = vmatpush3.bf16.msra.mxu0 %v1134_v49 }
  0x51   :  { %1058 = vmatprep.subr.bf16.mxu0 %v1190_v45 }
  0x52   :  { %1049 = vmatpush3.bf16.msra.mxu1 %v1132_v16 }
  0x53   :  { %1050 = vmatprep.subr.bf16.mxu1 %v1190_v45 }
  0x54   :  { %1059 = vmatpush3.bf16.msra.mxu0 %v1135_v50 }
  0x55   :  { %1060 = vmatprep.subr.bf16.mxu0 %v1190_v45 }
  0x56   :  { %1051 = vmatpush3.bf16.msra.mxu1 %v1133_v17 }
  0x58   :  { %1061 = vmatpush3.bf16.msra.mxu0 %v1136_v51 }
  0x59   :  { %1062 = vmatprep.subr.bf16.mxu0 %v1190_v45 }
  0x5c   :  { %1063 = vmatpush3.bf16.msra.mxu0 %v1137_v52 }
  0xef   :  { %v964_v18 = vpop.f32.mrf.mxu0 }
  0xf1   :  { %v965_v19 = vpop.f32.mrf.mxu0  ;;  %v986_v20 = vpop.f32.mrf.mxu1 }
  0xf2   :  { %v966_v30 = vadd.f32 %v965_v19, %v964_v18 }
  0xf3   :  { %v967_v21 = vpop.f32.mrf.mxu0  ;;  %v987_v22 = vpop.f32.mrf.mxu1 }
  0xf4   :  { %v531_v32 = vadd.f32 %v966_v30, %v880_v31  ;;  %v988_v33 = vadd.f32 %v987_v22, %v986_v20 }
  0xf5   :  { %v968_v23 = vpop.f32.mrf.mxu0  ;;  %v989_v24 = vpop.f32.mrf.mxu1 }
  0xf6   :  { %v571_v36 = vadd.f32 %v988_v33, %v531_v32 }
  0xf7   :  { %v990_v25 = vpop.f32.mrf.mxu1 }
  0xf9   :  { %v650_v26 = vpop.f32.mrf.mxu1 }
  0xfb   :  { %v1034_v27 = vpop.f32.mrf.mxu1 }
  0xfd   :  { %v653_v28 = vpop.f32.mrf.mxu1 }
  0xff   :  { %v1035_v29 = vpop.f32.mrf.mxu1 }
 0x10f   :  { %v1008_v34 = vpop.f32.mrf.mxu0 }
 0x111   :  { %v1009_v35 = vpop.f32.mrf.mxu0 }
 0x112   :  { %v1010_v37 = vadd.f32 %v1009_v35, %v1008_v34 }
 0x113   :  { %v1011_v38 = vpop.f32.mrf.mxu0 }
 0x114   :  { %v611_v39 = vadd.f32 %v1010_v37, %v571_v36 }
 0x115   :  { %v1012_v40 = vpop.f32.mrf.mxu0 }
 0x116   :  { %v651_v41 = vadd.f32 %v650_v26, %v611_v39 }
 0x118   :  { %v657_v42 = vmin.f32 %v651_v41, 0.0  ;;  %vm656_vm2 = vcmp.gt.f32.partialorder %v651_v41, 0.0 }
 0x11a   :  { %v658_v43 = vmul.f32 1.442695, %v657_v42 }
 0x11c   :  { %1138 = vpow2.f32 %v658_v43 }
 0x129   :  { %v1139_v44 = vpop.eup %1138 }
 0x12a   :  { %v931_v46 = vadd.f32 -1.0, %v1139_v44 }
 0x12c   :  { %v661_v47 = vsel %vm656_vm2, %v651_v41, %v931_v46 }
 0x12d   :  { %v679_v48 = vpack.c.bf16 %v661_v47, %v661_v47 }
 0x12f   :  { %1053 = vmatmul.mubr.bf16.vlgmr.msra.gmra.mxu1 %v679_v48 }
 0x1ef   :  { %v768_v54 = vpop.f32.mrf.mxu1 }
 0x1f0   :  { %v769_v55 = vadd.f32 %v932_v53, %v768_v54 }
 0x1f1   :  { %v1054_v56 = vpop.f32.mrf.mxu1 }
 0x1f2   :  { %v775_v57 = vmin.f32 %v769_v55, 0.0  ;;  %vm774_vm3 = vcmp.gt.f32.partialorder %v769_v55, 0.0 }
 0x1f3   :  { %v771_v58 = vpop.f32.mrf.mxu1 }
 0x1f4   :  { %v776_v59 = vmul.f32 1.442695, %v775_v57 }
 0x1f5   :  { %v1055_v60 = vpop.f32.mrf.mxu1 }
 0x1f6   :  { %1140 = vpow2.f32 %v776_v59 }
 0x203   :  { %v1141_v61 = vpop.eup %1140 }
 0x204   :  { %v941_v62 = vadd.f32 -1.0, %v1141_v61 }
 0x206   :  { %v779_v45 = vsel %vm774_vm3, %v769_v55, %v941_v62 }
 0x207   :  { %v789_v63 = vpack.c.bf16 %v779_v45, %v779_v45 }
 0x209   :  { %1065 = vmatmul.mubr.msk.bf16.vlgmr.msra.gmra.mxu0 %vm820_vm4, %v789_v63 }
 0x2c9   :  { %v858_v1 = vpop.f32.mrf.mxu0 }
 0x2ca   :  { %v859_v2 = vadd.f32 %v942_v0, %v858_v1 }
 0x2cb   :  { %v1066_v3 = vpop.f32.mrf.mxu0 }
 0x2cc   :  { %864 = vst [vmem:[#allocation5] sm:$0x3] %v859_v2 }
 0x2cd   :  { %v861_v4 = vpop.f32.mrf.mxu0 }
 0x2ce   :  { %1173 = shalt.err (!%p1170_p9)
}
 0x2cf   :  { %874 = dma.vmem_to_hbm [thread:$0]  %s872_s12, 32, %s1317_s7, [#allocation4]   ;;  %v1067_v5 = vpop.f32.mrf.mxu0 }
 0x2d0   :  { %1184 = dma.done.wait [#allocation4], 32  }
 0x2d1   :  { %1185 = vsyncadd [#allocation4], 4294967264 }
 0x2d2   :  { %878 = vsyncpa [#allocation3], 1 }
 0x2d3   :  { %879 = vsyncpa [#allocation4], 1 }

</bundles_post_ra>
